<compile_context>
chip_gen: v7x
topology: tpu7x:2x2x1
jax: 0.10.0
libtpu: 0.0.40
codegen_flags: <defaults>
</compile_context>

<pallas_src>
import jax
import jax.numpy as jnp
from jax.experimental import pallas as pl
from jax.experimental.pallas import tpu as pltpu

NUM_CLASSES = 3
GROUP = 14            # period of the weight table (self.w has shape (14, 3))
LANES = 128
MAX_LANE_TILE = 16384  # ~3 MiB streamed per step; double-buffered fits all generations


def _round_up(x: int, m: int) -> int:
    return (x + m - 1) // m * m


def _wce_kernel(x_ref, y_ref, w_ref, out_ref, acc_ref):
    """Accumulate per-(i % 14) sums of weight-scaled, label-selected log-softmax values.

    x_ref:   (3, 14, TM) logits (native dtype), class-major, lane axis = i // 14.
    y_ref:   (14, TM)    int8 labels (-1 marks padding -> contributes 0).
    w_ref:   (3, 14, 1)  f32 weight table, w_ref[c, g, 0] = w[g, c] (lane-broadcast).
    out_ref: (1, 1, 14)  f32 per-chunk partial sums.
    acc_ref: (14, TM)    f32 VMEM vector accumulator.
    """
    t = pl.program_id(1)

    @pl.when(t == 0)
    def _init():
        acc_ref[...] = jnp.zeros_like(acc_ref)

    x0 = x_ref[0].astype(jnp.float32)
    x1 = x_ref[1].astype(jnp.float32)
    x2 = x_ref[2].astype(jnp.float32)
    y = y_ref[...].astype(jnp.int32)

    # Numerically stable log-sum-exp over the 3 classes (VPU + EUP only).
    mx = jnp.maximum(jnp.maximum(x0, x1), x2)
    lse = mx + jnp.log(jnp.exp(x0 - mx) + jnp.exp(x1 - mx) + jnp.exp(x2 - mx))

    is0 = y == 0
    is1 = y == 1
    x_sel = jnp.where(is0, x0, jnp.where(is1, x1, x2))
    w_sel = jnp.where(is0, w_ref[0], jnp.where(is1, w_ref[1], w_ref[2]))
    contrib = w_sel * (x_sel - lse)
    acc_ref[...] += jnp.where(y >= 0, contrib, jnp.zeros_like(contrib))

    @pl.when(t == pl.num_programs(1) - 1)
    def _finalize():
        # Single cross-lane reduction per chunk (not per grid step).
        out_ref[...] = jnp.sum(acc_ref[...], axis=-1).reshape(1, 1, GROUP)


def weighted_cross_entropy(output: jax.Array, y: jax.Array, w: jax.Array) -> jax.Array:
    """-mean(log_softmax(output) * one_hot(y) * tile(w, N//14)) via a Pallas TPU kernel."""
    logits = output.reshape(-1, NUM_CLASSES)          # keep native dtype (f32 or bf16)
    labels = y.reshape(-1)
    n_rows = logits.shape[0]
    assert labels.shape[0] == n_rows
    assert n_rows % GROUP == 0, "module semantics require len(y) % 14 == 0"
    w = jnp.asarray(w, jnp.float32)
    assert w.shape == (GROUP, NUM_CLASSES)

    m = n_rows // GROUP
    # Megacore split: two "parallel" chunks whenever there are >= 256 lanes of work.
    n_chunks = 2 if m >= 2 * LANES else 1
    steps = -(-m // (MAX_LANE_TILE * n_chunks))                 # tiles per chunk
    tm = _round_up(-(-m // (steps * n_chunks)), LANES)          # < 128 pad lanes/tile
    mp = tm * steps * n_chunks

    # Wrapper-side layout plumbing: [class, i % 14, i // 14], lane-dense last dim.
    # TODO(synk): this transpose is an extra HBM pass over the logits; ideally the
    # producer emits the class-major (3, 14, m) layout directly.
    x = logits.reshape(m, GROUP, NUM_CLASSES).transpose(2, 1, 0)          # (3, 14, m)
    yk = labels.reshape(m, GROUP).transpose(1, 0).astype(jnp.int8)        # (14, m)
    if mp != m:
        x = jnp.pad(x, ((0, 0), (0, 0), (0, mp - m)))
        yk = jnp.pad(yk, ((0, 0), (0, mp - m)), constant_values=-1)
    wt = w.T.reshape(NUM_CLASSES, GROUP, 1)                               # (3, 14, 1)

    elems = GROUP * mp
    cost = pl.CostEstimate(
        flops=16 * elems,
        transcendentals=4 * elems,
        bytes_accessed=int(x.size * x.dtype.itemsize + yk.size
                           + wt.size * 4 + n_chunks * GROUP * 4),
    )

    partials = pl.pallas_call(
        _wce_kernel,
        out_shape=jax.ShapeDtypeStruct((n_chunks, 1, GROUP), jnp.float32),
        grid_spec=pltpu.PrefetchScalarGridSpec(
            num_scalar_prefetch=0,
            grid=(n_chunks, steps),
            in_specs=[
                pl.BlockSpec((NUM_CLASSES, GROUP, tm),
                             lambda c, t: (0, 0, c * steps + t)),
                pl.BlockSpec((GROUP, tm),
                             lambda c, t: (0, c * steps + t)),
                pl.BlockSpec((NUM_CLASSES, GROUP, 1),
                             lambda c, t: (0, 0, 0)),
            ],
            out_specs=pl.BlockSpec((1, 1, GROUP), lambda c, t: (c, 0, 0)),
            scratch_shapes=[pltpu.VMEM((GROUP, tm), jnp.float32)],
        ),
        compiler_params=pltpu.CompilerParams(
            dimension_semantics=("parallel", "arbitrary"),
        ),
        cost_estimate=cost,
    )(x, yk, wt)

    total = jnp.sum(partials)
    # TODO(synk): reference accumulates in float64; TPU kernel accumulates in float32.
    return -total / jnp.float32(NUM_CLASSES * n_rows)


if __name__ == "__main__":
    key = jax.random.PRNGKey(0)
    k1, k2, k3 = jax.random.split(key, 3)

    # Small shapes consistent with the module: batches of length-14 sequences, 3 classes.
    # batch=300 -> N=4200 rows, m=300 lanes: exercises megacore split + lane padding.
    batch = 300
    output = jax.random.normal(k1, (batch, GROUP, NUM_CLASSES), dtype=jnp.float32)
    y = jax.random.randint(k2, (batch, GROUP), 0, NUM_CLASSES, dtype=jnp.int32)
    w = jax.random.uniform(k3, (GROUP, NUM_CLASSES), dtype=jnp.float32,
                           minval=0.5, maxval=1.5)

    loss = weighted_cross_entropy(output, y, w)
    jax.block_until_ready(loss)

    # Pure-JAX reference (float32 on TPU).
    scores = jax.nn.softmax(output.reshape(-1, NUM_CLASSES), axis=1)
    y_onehot = jax.nn.one_hot(y.reshape(-1), NUM_CLASSES, dtype=jnp.float32)
    weights = jnp.tile(w, (y.size // GROUP, 1))
    ref = -jnp.mean(jnp.log(scores) * y_onehot * weights)

    assert jnp.allclose(loss, ref, rtol=1e-5, atol=1e-5), (loss, ref)
    print("KERNEL_OK")
</pallas_src>

<mosaic_0001>
module attributes {stable_mosaic.version = 11 : i64} {
  func.func @_wce_kernel(%arg0: i32, %arg1: i32, %arg2: memref<3x14x256xf32, #tpu.memory_space<vmem>>, %arg3: memref<14x256xi8, #tpu.memory_space<vmem>>, %arg4: memref<3x14x1xf32, #tpu.memory_space<vmem>>, %arg5: memref<1x1x14xf32, #tpu.memory_space<vmem>>, %arg6: memref<14x256xf32, #tpu.memory_space<vmem>>) attributes {dimension_semantics = [#tpu.dimension_semantics<parallel>, #tpu.dimension_semantics<arbitrary>], iteration_bounds = array<i64: 2, 1>, scalar_prefetch = 0 : i64, scratch_operands = 1 : i64, tpu.core_type = #tpu.core_type<tc>, window_params = [{transform_indices = @transform_0, window_bounds = array<i64: 3, 14, 256>}, {transform_indices = @transform_1, window_bounds = array<i64: 14, 256>}, {pipeline_mode = #tpu.pipeline_mode<synchronous>, transform_indices = @transform_2, window_bounds = array<i64: 3, 14, 1>}, {transform_indices = @transform_3, window_bounds = array<i64: 1, 1, 14>}]} {
    %c0_i32 = arith.constant 0 : i32
    %0 = arith.cmpi eq, %arg1, %c0_i32 : i32
    %1 = arith.extui %0 : i1 to i32
    %c0_i32_0 = arith.constant 0 : i32
    %2 = arith.cmpi ne, %1, %c0_i32_0 : i32
    scf.if %2 {
      %cst_26 = arith.constant 0.000000e+00 : f32
      %55 = vector.broadcast %cst_26 : f32 to vector<14x256xf32>
      %c0_27 = arith.constant 0 : index
      %c0_28 = arith.constant 0 : index
      %56 = vector.load %arg6[%c0_27, %c0_28] : memref<14x256xf32, #tpu.memory_space<vmem>>, vector<14x256xf32>
      tpu.vector_store %arg6[%c0_27, %c0_28], %55 {strides = array<i32>} : memref<14x256xf32, #tpu.memory_space<vmem>>, vector<14x256xf32>,
    } else {
    }
    %c0 = arith.constant 0 : index
    %c0_1 = arith.constant 0 : index
    %c0_2 = arith.constant 0 : index
    %3 = vector.load %arg2[%c0, %c0_1, %c0_2] : memref<3x14x256xf32, #tpu.memory_space<vmem>>, vector<1x14x256xf32>
    %4 = vector.shape_cast %3 : vector<1x14x256xf32> to vector<14x256xf32>
    %c1 = arith.constant 1 : index
    %c0_3 = arith.constant 0 : index
    %c0_4 = arith.constant 0 : index
    %5 = vector.load %arg2[%c1, %c0_3, %c0_4] : memref<3x14x256xf32, #tpu.memory_space<vmem>>, vector<1x14x256xf32>
    %6 = vector.shape_cast %5 : vector<1x14x256xf32> to vector<14x256xf32>
    %c2 = arith.constant 2 : index
    %c0_5 = arith.constant 0 : index
    %c0_6 = arith.constant 0 : index
    %7 = vector.load %arg2[%c2, %c0_5, %c0_6] : memref<3x14x256xf32, #tpu.memory_space<vmem>>, vector<1x14x256xf32>
    %8 = vector.shape_cast %7 : vector<1x14x256xf32> to vector<14x256xf32>
    %c0_7 = arith.constant 0 : index
    %c0_8 = arith.constant 0 : index
    %9 = vector.load %arg3[%c0_7, %c0_8] : memref<14x256xi8, #tpu.memory_space<vmem>>, vector<14x256xi8>
    %10 = arith.extsi %9 : vector<14x256xi8> to vector<14x256xi32>
    %11 = arith.maximumf %4, %6 : vector<14x256xf32>
    %12 = arith.maximumf %11, %8 : vector<14x256xf32>
    %13 = arith.subf %4, %12 : vector<14x256xf32>
    %14 = math.exp %13 : vector<14x256xf32>
    %15 = arith.subf %6, %12 : vector<14x256xf32>
    %16 = math.exp %15 : vector<14x256xf32>
    %17 = arith.addf %14, %16 : vector<14x256xf32>
    %18 = arith.subf %8, %12 : vector<14x256xf32>
    %19 = math.exp %18 : vector<14x256xf32>
    %20 = arith.addf %17, %19 : vector<14x256xf32>
    %21 = math.log %20 : vector<14x256xf32>
    %22 = arith.addf %12, %21 : vector<14x256xf32>
    %c0_i32_9 = arith.constant 0 : i32
    %23 = vector.broadcast %c0_i32_9 : i32 to vector<14x256xi32>
    %24 = arith.cmpi eq, %10, %23 : vector<14x256xi32>
    %c1_i32 = arith.constant 1 : i32
    %25 = vector.broadcast %c1_i32 : i32 to vector<14x256xi32>
    %26 = arith.cmpi eq, %10, %25 : vector<14x256xi32>
    %27 = arith.select %26, %6, %8 : vector<14x256xi1>, vector<14x256xf32>
    %28 = arith.select %24, %4, %27 : vector<14x256xi1>, vector<14x256xf32>
    %c0_10 = arith.constant 0 : index
    %c0_11 = arith.constant 0 : index
    %c0_12 = arith.constant 0 : index
    %29 = vector.load %arg4[%c0_10, %c0_11, %c0_12] : memref<3x14x1xf32, #tpu.memory_space<vmem>>, vector<1x14x1xf32>
    %30 = vector.shape_cast %29 : vector<1x14x1xf32> to vector<14x1xf32>
    %c1_13 = arith.constant 1 : index
    %c0_14 = arith.constant 0 : index
    %c0_15 = arith.constant 0 : index
    %31 = vector.load %arg4[%c1_13, %c0_14, %c0_15] : memref<3x14x1xf32, #tpu.memory_space<vmem>>, vector<1x14x1xf32>
    %32 = vector.shape_cast %31 : vector<1x14x1xf32> to vector<14x1xf32>
    %c2_16 = arith.constant 2 : index
    %c0_17 = arith.constant 0 : index
    %c0_18 = arith.constant 0 : index
    %33 = vector.load %arg4[%c2_16, %c0_17, %c0_18] : memref<3x14x1xf32, #tpu.memory_space<vmem>>, vector<1x14x1xf32>
    %34 = vector.shape_cast %33 : vector<1x14x1xf32> to vector<14x1xf32>
    %35 = vector.shape_cast %32 : vector<14x1xf32> to vector<14x1xf32>
    %36 = vector.broadcast %35 : vector<14x1xf32> to vector<14x256xf32>
    %37 = vector.shape_cast %34 : vector<14x1xf32> to vector<14x1xf32>
    %38 = vector.broadcast %37 : vector<14x1xf32> to vector<14x256xf32>
    %39 = arith.select %26, %36, %38 : vector<14x256xi1>, vector<14x256xf32>
    %40 = vector.shape_cast %30 : vector<14x1xf32> to vector<14x1xf32>
    %41 = vector.broadcast %40 : vector<14x1xf32> to vector<14x256xf32>
    %42 = arith.select %24, %41, %39 : vector<14x256xi1>, vector<14x256xf32>
    %43 = arith.subf %28, %22 : vector<14x256xf32>
    %44 = arith.mulf %42, %43 : vector<14x256xf32>
    %c0_19 = arith.constant 0 : index
    %c0_20 = arith.constant 0 : index
    %45 = vector.load %arg6[%c0_19, %c0_20] : memref<14x256xf32, #tpu.memory_space<vmem>>, vector<14x256xf32>
    %c0_i32_21 = arith.constant 0 : i32
    %46 = vector.broadcast %c0_i32_21 : i32 to vector<14x256xi32>
    %47 = arith.cmpi sge, %10, %46 : vector<14x256xi32>
    %cst = arith.constant 0.000000e+00 : f32
    %48 = vector.broadcast %cst : f32 to vector<14x256xf32>
    %49 = arith.select %47, %44, %48 : vector<14x256xi1>, vector<14x256xf32>
    %50 = arith.addf %45, %49 : vector<14x256xf32>
    %c0_22 = arith.constant 0 : index
    %c0_23 = arith.constant 0 : index
    %51 = vector.load %arg6[%c0_22, %c0_23] : memref<14x256xf32, #tpu.memory_space<vmem>>, vector<14x256xf32>
    tpu.vector_store %arg6[%c0_22, %c0_23], %50 {strides = array<i32>} : memref<14x256xf32, #tpu.memory_space<vmem>>, vector<14x256xf32>,
    %c0_i32_24 = arith.constant 0 : i32
    %52 = arith.cmpi eq, %arg1, %c0_i32_24 : i32
    %53 = arith.extui %52 : i1 to i32
    %c0_i32_25 = arith.constant 0 : i32
    %54 = arith.cmpi ne, %53, %c0_i32_25 : i32
    scf.if %54 {
      %c0_26 = arith.constant 0 : index
      %c0_27 = arith.constant 0 : index
      %55 = vector.load %arg6[%c0_26, %c0_27] : memref<14x256xf32, #tpu.memory_space<vmem>>, vector<14x256xf32>
      %cst_28 = arith.constant dense<0.000000e+00> : vector<14xf32>
      %56 = vector.multi_reduction <add>, %55, %cst_28 [1] : vector<14x256xf32> to vector<14xf32>
      %57 = vector.shape_cast %56 : vector<14xf32> to vector<1x1x14xf32>
      %c0_29 = arith.constant 0 : index
      %c0_30 = arith.constant 0 : index
      %c0_31 = arith.constant 0 : index
      %58 = vector.load %arg5[%c0_29, %c0_30, %c0_31] : memref<1x1x14xf32, #tpu.memory_space<vmem>>, vector<1x1x14xf32>
      tpu.vector_store %arg5[%c0_29, %c0_30, %c0_31], %57 {strides = array<i32>} : memref<1x1x14xf32, #tpu.memory_space<vmem>>, vector<1x1x14xf32>,
    } else {
    }
    return
  }
  func.func @transform_0(%arg0: i32, %arg1: i32) -> (i32, i32, i32) {
    %c1_i32 = arith.constant 1 : i32
    %0 = arith.muli %arg0, %c1_i32 : i32
    %1 = arith.addi %0, %arg1 : i32
    %c0_i32 = arith.constant 0 : i32
    %c0_i32_0 = arith.constant 0 : i32
    %c0_i32_1 = arith.constant 0 : i32
    return %c0_i32, %c0_i32_0, %1 : i32, i32, i32
  }
  func.func @transform_1(%arg0: i32, %arg1: i32) -> (i32, i32) {
    %c1_i32 = arith.constant 1 : i32
    %0 = arith.muli %arg0, %c1_i32 : i32
    %1 = arith.addi %0, %arg1 : i32
    %c0_i32 = arith.constant 0 : i32
    %c0_i32_0 = arith.constant 0 : i32
    return %c0_i32, %1 : i32, i32
  }
  func.func @transform_2(%arg0: i32, %arg1: i32) -> (i32, i32, i32) {
    %c0_i32 = arith.constant 0 : i32
    %c0_i32_0 = arith.constant 0 : i32
    %c0_i32_1 = arith.constant 0 : i32
    %c0_i32_2 = arith.constant 0 : i32
    return %c0_i32, %c0_i32_0, %c0_i32_1 : i32, i32, i32
  }
  func.func @transform_3(%arg0: i32, %arg1: i32) -> (i32, i32, i32) {
    %c0_i32 = arith.constant 0 : i32
    %c0_i32_0 = arith.constant 0 : i32
    %c0_i32_1 = arith.constant 0 : i32
    return %arg0, %c0_i32, %c0_i32_0 : i32, i32, i32
  }
}

</mosaic_0001>

<bundles_post_ra>
// kernel: tpu_custom_call.1
= control target key start
LH: loop header
LB: loop body
LE: loop exit
PB: predicated region body
PF: predicated region fallthrough
CT: control target
= control target key end

     0   :  { %8 = vsyncpa [#allocation4], 0  ;;  %s1178_s0 = inlined_call_operand.hbm [shape: f32[3,14,512], index: 0, kind: input, shape index: {}]   ;;  %s1179_s1 = inlined_call_operand.vmem [shape: s8[14,512], index: 1, kind: input, shape index: {}]   ;;  %s1180_s2 = inlined_call_operand.vmem [shape: f32[3,14,1], index: 2, kind: input, shape index: {}]   ;;  %s1181_s3 = inlined_call_operand.hbm [shape: f32[2,1,14], index: 3, kind: output, shape index: {}]  }
   0x1   :  { %10 = vsyncpa [#allocation4 + $0x1], 0 }
   0x2   :  { %11 = vsyncpa [#allocation5], 0 }
   0x3   :  { %13 = vsyncpa [#allocation5 + $0x1], 0  ;;  %s870_s12 = smov 0   ;;  %s872_s13 = smov 0  }
   0x4   :  { %s874_s14 = smov 0   ;;  %s876_s15 = smov 0  }
   0x5   :  { %s878_s16 = smov 0   ;;  %s880_s17 = smov 0  }
   0x6 LB: > { %s599_s18 = sadd.s32 4294967295, %s841_s17   ;;  %s600_s19 = sadd.s32 4294967294, %s841_s17   ;;  %s841_s17 = sphi %s880_s17, %s19_s17   ;;  %s837_s16 = sphi %s878_s16, %s1195_s16   ;;  %s833_s15 = sphi %s876_s15, %s1194_s15   ;;  %s829_s14 = sphi %s874_s14, %s1193_s14   ;;  %s825_s13 = sphi %s872_s13, %s1192_s13   ;;  %s821_s12 = sphi %s870_s12, %s1191_s12  }
   0x7   : > { %s31_s20 = sadd.s32 1, %s837_s16  ;;  %s40_s21 = sadd.s32 1, %s829_s14 }
   0x8   : > { %p33_p0 = scmp.ge.s32.totalorder %s31_s20, 2  ;;  %p47_p1 = scmp.ne.s32.totalorder %s829_s14, %s825_s13 }
   0x9   : > { %p48_p2 = scmp.eq.s32.totalorder %s841_s17, 0  ;;  %p53_p3 = scmp.ne.s32.totalorder %s825_s13, %s821_s12 }
   0xa   : > { %s1197_s20 = smov (%p33_p0, %s31_s20), 0  ;;  %p54_p5 = scmp.eq.s32.totalorder %s599_s18, 0 }
   0xb   : > { %p911_p4 = por %p48_p2, %p47_p1  ;;  %s37_s23 = ssub.s32 %s837_s16, %s1197_s20 }
   0xc   : > { %p126_p6 = scmp.eq.s32.totalorder %s599_s18, 1  ;;  %p38_p7 = scmp.eq.s32.totalorder %s37_s23, 0 }
   0xd   : > { %p917_p8 = por %p54_p5, %p53_p3  ;;  %p132_p10 = scmp.eq.s32.totalorder %s600_s19, 1 }
   0xe   : > { %p921_p9 = por %p126_p6, %p47_p1  ;;  %p1182_p12 = scmp.ge.s32.totalorder %s841_s17, 2 }
   0xf   : > { %s926_s26 = scalar_select %p38_p7, %s829_s14, %s40_s21  }
  0x10   : > { %s1186_s25 = scalar_select %p921_p9, 1, 0 }
  0x11   : > { %p928_p11 = por %p132_p10, %p53_p3  ;;  %151 = sbr.rel (%p1182_p12) target bundleno = 52 (0x34), region = 20 }
  0x12   : > { %s936_s28 = sand.u32 (!%p1182_p12), 1, %s829_s14   ;;  %s625_s29 = sshll.u32 (!%p1182_p12), %s837_s16, 8 }
  0x13   : > { %s1187_s27 = scalar_select %p928_p11, 1, 0 }
  0x14   : > { %s633_s30 = smul.u32 (!%p1182_p12), 96, %s936_s28  ;;  %s943_s6 = scalar_lea.hbm (!%p1182_p12), %s1178_s0, %s625_s29 }
  0x15   : > { %s156_s9 = scalar_lea.sflag (!%p1182_p12), [#allocation4], %s936_s28  ;;  %s731_s10 = scalar_lea.hbm (!%p1182_p12), %s943_s6, 1536 }
  0x16   : > { %s159_s7 = scalar_lea.vmem (!%p1182_p12), [#allocation3], %s633_s30  ;;  %p732_p13 = scmp.ne.s32.totalorder (!%p1182_p12), %s943_s6, %s731_s10 }
  0x17   : > { %s167_s8 = sshll.u32 (!%p1182_p12), %s159_s7, 4  ;;  %s735_s19 = scalar_lea.hbm (!%p1182_p12), %s1178_s0, 3072  ;;  %s945_s8 = int_to_ptr.vmem [resolvable:$true] %s167_s8 }
  0x18   : > { %p733_p0 = pnand %p732_p13, %p911_p4  ;;  %p736_p2 = scmp.lt.u32.totalorder %s943_s6, %s1178_s0 }
  0x19   : > { %p737_p3 = scmp.lt.u32.totalorder %s735_s19, %s731_s10  ;;  %p739_p6 = scmp.lt.u32.totalorder %s731_s10, %s943_s6 }
  0x1a   : > { %p734_p1 = pneg %p733_p0 }
  0x1b   : > { %p738_p5 = por %p737_p3, %p736_p2 }
  0x1d   : > { %p740_p7 = por %p739_p6, %p738_p5 }
  0x1f   : > { %p741_p10 = pnand %p740_p7, %p734_p1 }
  0x21   : > { %744 = shalt.err (!%p741_p10)
}
  0x22   : > { %s745_s29 = scalar_lea.vmem %s945_s8, 1536  ;;  %s843_s30 = smov [#allocation3]  }
  0x23   : > { %p746_p13 = scmp.ne.s32.totalorder %s945_s8, %s745_s29  ;;  %s749_s4 = sshll.u32 %s843_s30, 4  ;;  %s750_s4 = int_to_ptr.vmem [resolvable:$false] %s749_s4 }
  0x24   : > { %s751_s5 = scalar_lea.vmem %s750_s4, 3072  ;;  %p752_p11 = scmp.lt.s32.totalorder %s945_s8, %s750_s4 }
  0x25   : > { %p747_p0 = pnand %p746_p13, %p911_p4  ;;  %p753_p9 = scmp.lt.s32.totalorder %s751_s5, %s745_s29 }
  0x27   : > { %p748_p12 = pneg %p747_p0  ;;  %p754_p2 = por %p753_p9, %p752_p11 }
  0x29   : > { %p755_p3 = pnand %p754_p2, %p748_p12 }
  0x2b   : > { %758 = shalt.err (!%p755_p3)
}
  0x2c   : > { %s844_s7 = smov 512   ;;  %s845_s10 = smov 256  }
  0x2d   : > { %s846_s11 = smov 16   ;;  %176 = sbr.rel (!%p911_p4) target bundleno = 52 (0x34), region = 28 }
  0x2e   : > { %635 = dma.hbm_to_vmem [thread:$0]  (%p911_p4), %s943_s6, 1536, %s945_s8, %s156_s9, %s844_s7, %s845_s10, %s846_s11  }
  0x2f   : > { %s605_s18 = sshll.u32 (%p911_p4), %s936_s28, 3  ;;  %s626_s19 = sshll.u32 (%p911_p4), %s837_s16, 2 }
  0x30   : > { %s184_s29 = scalar_lea.vmem (%p911_p4), %s1179_s1, %s626_s19  ;;  %s180_s30 = scalar_lea.vmem (%p911_p4), [#allocation6], %s605_s18 }
  0x31   : > { %v200_v0 = vld [vmem:[%s184_s29] sm:$0xf] (%p911_p4)  ;;  %v202_v1 = vld [vmem:[%s184_s29 + $0x8] sm:$0xf] (%p911_p4) }
  0x32   : > { %201 = vst [vmem:[%s180_s30] sm:$0xf] (%p911_p4), %v200_v0  ;;  %203 = vst [vmem:[%s180_s30 + $0x4] sm:$0xf] (%p911_p4), %v202_v1 }
  0x34 PF: > { %p608_p9 = scmp.ge.s32.totalorder %s841_s17, 1  ;;  %p229_p11 = scmp.lt.s32.totalorder %s841_s17, 3 }
  0x36   : > { %p230_p4 = pnand %p608_p9, %p229_p11 }
  0x37   : > { %s981_s22 = sand.u32 (!%p230_p4), 1, %s825_s13  }
  0x38   : > { %233 = sbr.rel (%p230_p4) target bundleno = 378 (0x17a), region = 69  ;;  %s236_s6 = scalar_lea.sflag (!%p230_p4), [#allocation4], %s981_s22 }
  0x39   : > { %s634_s28 = smul.u32 (!%p230_p4), 96, %s981_s22 }
  0x3b   : > { %s985_s8 = scalar_lea.vmem (!%p230_p4), [#allocation3], %s634_s28 }
  0x3f   : > { %812 = dma.done.wait (%p917_p8), %s236_s6, 1536  }
  0x40   : > { %814 = vsyncadd (%p917_p8), %s236_s6, 4294965760  ;;  %v847_v2 = vmov 0   ;;  %v619_v3 = vld [vmem:[%s1180_s2 + $0x18] sm:$0x3f]  ;;  %v618_v4 = vld [vmem:[%s1180_s2 + $0x10] sm:$0xff]  ;;  %v848_v9 = vmov 0.0  }
  0x41   : > { %698 = vset.pattern.permute.xlu1 %v847_v2  ;;  %697 = vset.pattern.permute.xlu0 %v847_v2  ;;  %v621_v5 = vld [vmem:[%s1180_s2 + $0x28] sm:$0x3f]  ;;  %v620_v6 = vld [vmem:[%s1180_s2 + $0x20] sm:$0xff]  ;;  %282 = vst [vmem:[#allocation2 + $0x10] sm:$0x3f] %v848_v9  ;;  %s609_s30 = sshll.u32 %s981_s22, 3 }
  0x42   : > { %399 = vperm.xlu0 %697, %v619_v3   ;;  %394 = vperm.xlu1 %698, %v618_v4   ;;  %v385_v7 = vld [vmem:[%s1180_s2 + $0x8] sm:$0x3f]  ;;  %v384_v8 = vld [vmem:[%s1180_s2] sm:$0xff]  ;;  %283 = vst [vmem:[#allocation2 + $0x18] sm:$0x3f] %v848_v9  ;;  %s247_s28 = scalar_lea.vmem [#allocation6], %s609_s30 }
  0x43   : > { %v1010_v10 = vld [vmem:[%s985_s8 + $0x30] sm:$0x3f]  ;;  %v1016_v12 = vld [vmem:[%s985_s8 + $0x38] sm:$0x3f]  ;;  %v1027_v16 = vld [vmem:[%s985_s8 + $0x20] sm:$0xff]  ;;  %vm468_vm12 = vcmask 1045504  }
  0x44   : > { %v1013_v11 = vld [vmem:[%s985_s8 + $0x10] sm:$0x3f]  ;;  %v1019_v13 = vld [vmem:[%s985_s8 + $0x18] sm:$0x3f]  ;;  %v1032_v18 = vld [vmem:[%s985_s8] sm:$0xff]  ;;  %s622_s6 = sshll.u32 %s833_s15, 4 }
  0x45   : > { %v306_v14 = vmax.f32 %v1013_v11, %v1010_v10  ;;  %v1024_v15 = vld [vmem:[%s985_s8 + $0x50] sm:$0x3f]  ;;  %v307_v17 = vmax.f32 %v1019_v13, %v1016_v12  ;;  %v1035_v19 = vld [vmem:[%s985_s8 + $0x58] sm:$0x3f]  ;;  %v1038_v20 = vld [vmem:[%s985_s8 + $0x28] sm:$0xff]  ;;  %v304_v23 = vmax.f32 %v1032_v18, %v1027_v16  ;;  %vm487_vm13 = vcmask 130112   ;;  %s1129_s7 = scalar_lea.hbm %s1181_s3, %s622_s6 }
  0x46   : > { %409 = vperm.xlu0 %697, %v621_v5   ;;  %404 = vperm.xlu1 %698, %v620_v6   ;;  %v1041_v21 = vld [vmem:[%s985_s8 + $0x8] sm:$0xff]  ;;  %v1049_v24 = vld [vmem:[%s985_s8 + $0x40] sm:$0xff]  ;;  %vm490_vm14 = vcmask 106496   ;;  %s493_s15 = scalar_lea.sflag [#allocation5], %s981_s22  ;;  %p1188_p12 = scmp.ne.s32.totalorder %s1186_s25, 0 }
  0x47   : > { %v1044_v22 = vmax.f32 %v306_v14, %v1024_v15  ;;  %v1052_v25 = vmax.f32 %v307_v17, %v1035_v19  ;;  %v305_v26 = vmax.f32 %v1041_v21, %v1038_v20  ;;  %v1057_v27 = vld [vmem:[%s985_s8 + $0x48] sm:$0xff]  ;;  %v1062_v29 = vmax.f32 %v304_v23, %v1049_v24  ;;  %s271_s8 = scalar_lea.vmem [#allocation7], %s981_s22  ;;  %s849_s24 = smov [#allocation7]  }
  0x48   : > { %v628_v14 = vld [vmem:[%s247_s28] sm:$0xff]   ;;  %s505_s9 = sshll.u32 %s271_s8, 4  ;;  %s763_s11 = sshll.u32 %s849_s24, 4  ;;  %s1131_s9 = int_to_ptr.vmem [resolvable:$true] %s505_s9  ;;  %s764_s11 = int_to_ptr.vmem [resolvable:$false] %s763_s11 }
  0x49   : > { %v314_v28 = vsub.f32 %v1013_v11, %v1044_v22  ;;  %v315_v30 = vsub.f32 %v1019_v13, %v1052_v25  ;;  %v1067_v31 = vmax.f32 %v305_v26, %v1057_v27  ;;  %v326_v32 = vsub.f32 %v1010_v10, %v1044_v22  ;;  %s759_s10 = scalar_lea.vmem %s1131_s9, 16  ;;  %s765_s18 = scalar_lea.vmem %s764_s11, 32 }
  0x4a   : > { %423 = vperm.xlu0 %697, %v385_v7   ;;  %418 = vperm.xlu1 %698, %v384_v8   ;;  %v327_v33 = vsub.f32 %v1016_v12, %v1052_v25  ;;  %v312_v35 = vsub.f32 %v1032_v18, %v1062_v29  ;;  %v324_v39 = vsub.f32 %v1027_v16, %v1062_v29  ;;  %v631_v23 = vunpack.c.2.s8 %v628_v14  ;;  %p760_p8 = scmp.ne.s32.totalorder %s1131_s9, %s759_s10  ;;  %p766_p6 = scmp.lt.s32.totalorder %s1131_s9, %s764_s11 }
  0x4b   : > { %v320_v34 = vmul.f32 1.442695, %v314_v28  ;;  %v322_v36 = vmul.f32 1.442695, %v315_v30  ;;  %v313_v37 = vsub.f32 %v1041_v21, %v1067_v31  ;;  %v332_v38 = vmul.f32 1.442695, %v326_v32  ;;  %p767_p7 = scmp.lt.s32.totalorder %s765_s18, %s759_s10 }
  0x4c   : > { %v334_v40 = vmul.f32 1.442695, %v327_v33  ;;  %v325_v41 = vsub.f32 %v1038_v20, %v1067_v31  ;;  %v342_v42 = vsub.f32 %v1024_v15, %v1044_v22  ;;  %v316_v43 = vmul.f32 1.442695, %v312_v35  ;;  %p761_p1 = pnand %p760_p8, %p1188_p12 }
  0x4d   : > { %699 = vpow2.f32 %v320_v34  ;;  %v343_v44 = vsub.f32 %v1035_v19, %v1052_v25  ;;  %v318_v45 = vmul.f32 1.442695, %v313_v37  ;;  %v328_v46 = vmul.f32 1.442695, %v324_v39  ;;  %p768_p10 = por %p767_p7, %p766_p6 }
  0x4e   : > { %701 = vpow2.f32 %v322_v36  ;;  %v340_v47 = vsub.f32 %v1049_v24, %v1062_v29  ;;  %v330_v48 = vmul.f32 1.442695, %v325_v41  ;;  %v341_v49 = vsub.f32 %v1057_v27, %v1067_v31  ;;  %p762_p5 = pneg %p761_p1 }
  0x4f   : > { %703 = vpow2.f32 %v332_v38  ;;  %v348_v50 = vmul.f32 1.442695, %v342_v42  ;;  %v350_v51 = vmul.f32 1.442695, %v343_v44  ;;  %v632_v26 = vunpack.c.3.s8 %v628_v14 }
  0x50   : > { %705 = vpow2.f32 %v334_v40  ;;  %v344_v52 = vmul.f32 1.442695, %v340_v47  ;;  %v346_v53 = vmul.f32 1.442695, %v341_v49  ;;  %v629_v30 = vunpack.c.0.s8 %v628_v14  ;;  %p769_p13 = pnand %p768_p10, %p762_p5 }
  0x51   : > { %707 = vpow2.f32 %v316_v43  ;;  %v630_v32 = vunpack.c.1.s8 %v628_v14  ;;  %vm374_vm0 = vcmp.eq.s32.totalorder %v631_v23, 1  ;;  %vm375_vm1 = vcmp.eq.s32.totalorder %v632_v26, 1 }
  0x52   : > { %709 = vpow2.f32 %v318_v45  ;;  %vm372_vm2 = vcmp.eq.s32.totalorder %v629_v30, 1  ;;  %v378_v39 = vsel %vm374_vm0, %v1010_v10, %v1024_v15  ;;  %v379_v40 = vsel %vm375_vm1, %v1016_v12, %v1035_v19 }
  0x53   : > { %711 = vpow2.f32 %v328_v46  ;;  %vm373_vm3 = vcmp.eq.s32.totalorder %v630_v32, 1  ;;  %vm370_vm4 = vcmp.eq.s32.totalorder %v631_v23, 0  ;;  %vm371_vm5 = vcmp.eq.s32.totalorder %v632_v26, 0 }
  0x54   : > { %713 = vpow2.f32 %v330_v48  ;;  %v376_v43 = vsel %vm372_vm2, %v1027_v16, %v1049_v24  ;;  %v377_v44 = vsel %vm373_vm3, %v1038_v20, %v1057_v27  ;;  %vm368_vm6 = vcmp.eq.s32.totalorder %v629_v30, 0 }
  0x55   : > { %715 = vpow2.f32 %v348_v50  ;;  %vm369_vm7 = vcmp.eq.s32.totalorder %v630_v32, 0  ;;  %v382_v12 = vsel %vm370_vm4, %v1013_v11, %v378_v39  ;;  %v383_v19 = vsel %vm371_vm5, %v1019_v13, %v379_v40 }
  0x56   : > { %717 = vpow2.f32 %v350_v51  ;;  %v380_v24 = vsel %vm368_vm6, %v1032_v18, %v376_v43  ;;  %v381_v20 = vsel %vm369_vm7, %v1041_v21, %v377_v44  ;;  %vm444_vm8 = vcmp.ge.s32.totalorder %v631_v23, 0 }
  0x57   : > { %v700_v54 = vpop.eup %699  ;;  %719 = vpow2.f32 %v344_v52  ;;  %vm445_vm9 = vcmp.ge.s32.totalorder %v632_v26, 0  ;;  %vm442_vm10 = vcmp.ge.s32.totalorder %v629_v30, 0  ;;  %vm443_vm11 = vcmp.ge.s32.totalorder %v630_v32, 0 }
  0x58   : > { %v702_v55 = vpop.eup %701  ;;  %721 = vpow2.f32 %v346_v53 }
  0x59   : > { %v704_v56 = vpop.eup %703 }
  0x5a   : > { %v706_v57 = vpop.eup %705  ;;  %v338_v62 = vadd.f32 %v704_v56, %v700_v54  ;;  %v441_v56 = vld [vmem:[#allocation2 + $0x18] sm:$0x3f] }
  0x5b   : > { %v708_v58 = vpop.eup %707  ;;  %v339_v0 = vadd.f32 %v706_v57, %v702_v55  ;;  %v440_v55 = vld [vmem:[#allocation2 + $0x10] sm:$0x3f] }
  0x5c   : > { %v710_v59 = vpop.eup %709 }
  0x5d   : > { %v712_v60 = vpop.eup %711 }
  0x5e   : > { %v714_v61 = vpop.eup %713  ;;  %v336_v2 = vadd.f32 %v712_v60, %v708_v58 }
  0x5f   : > { %v716_v63 = vpop.eup %715  ;;  %v337_v4 = vadd.f32 %v714_v61, %v710_v59 }
  0x60   : > { %v718_v1 = vpop.eup %717  ;;  %v354_v6 = vadd.f32 %v716_v63, %v338_v62 }
  0x61   : > { %v720_v3 = vpop.eup %719  ;;  %v355_v7 = vadd.f32 %v718_v1, %v339_v0 }
  0x62   : > { %v722_v5 = vpop.eup %721  ;;  %v352_v8 = vadd.f32 %v720_v3, %v336_v2  ;;  %723 = vlog2.f32 %v354_v6 }
  0x63   : > { %v353_v9 = vadd.f32 %v722_v5, %v337_v4  ;;  %725 = vlog2.f32 %v355_v7  ;;  %v476_v7 = vlaneseq }
  0x64   : > { %727 = vlog2.f32 %v352_v8 }
  0x65   : > { %729 = vlog2.f32 %v353_v9  ;;  %v477_v8 = vand.u32 127, %v476_v7  ;;  %v479_v9 = vshrl.u32 %v476_v7, 7 }
  0x67   : > { %v482_v14 = vadd.s32 4294967288, %v477_v8 }
  0x69   : > { %v485_v23 = vsub.s32 %v482_v14, %v479_v9 }
  0x6c   : > { %v724_v17 = vpop.eup %723 }
  0x6d   : > { %v726_v28 = vpop.eup %725  ;;  %v361_v35 = vmul.f32 0.6931472, %v724_v17  ;;  %v480_v17 = vsub.s32 %v477_v8, %v479_v9 }
  0x6e   : > { %v728_v33 = vpop.eup %727  ;;  %v363_v36 = vmul.f32 0.6931472, %v726_v28 }
  0x6f   : > { %v730_v34 = vpop.eup %729  ;;  %v357_v37 = vmul.f32 0.6931472, %v728_v33  ;;  %v366_v10 = vadd.f32 %v361_v35, %v1044_v22 }
  0x70   : > { %v359_v38 = vmul.f32 0.6931472, %v730_v34  ;;  %v367_v15 = vadd.f32 %v363_v36, %v1052_v25 }
  0x71   : > { %v364_v45 = vadd.f32 %v357_v37, %v1062_v29  ;;  %v432_v46 = vsub.f32 %v382_v12, %v366_v10 }
  0x72   : > { %v365_v16 = vadd.f32 %v359_v38, %v1067_v31  ;;  %v433_v25 = vsub.f32 %v383_v19, %v367_v15 }
  0x73   : > { %v430_v48 = vsub.f32 %v380_v24, %v364_v45 }
  0x74   : > { %v431_v13 = vsub.f32 %v381_v20, %v365_v16 }
  0xc1   : > { %v400_v41 = vpop.permute.xlu0 %399  ;;  %v395_v42 = vpop.permute.xlu1 %394 }
  0xc5   : > { %v410_v27 = vpop.permute.xlu0 %409  ;;  %v405_v22 = vpop.permute.xlu1 %404 }
  0xc6   : > { %v412_v47 = vsel %vm372_vm2, %v395_v42, %v405_v22  ;;  %v413_v11 = vsel %vm373_vm3, %v395_v42, %v405_v22  ;;  %v414_v29 = vsel %vm374_vm0, %v400_v41, %v410_v27  ;;  %v415_v31 = vsel %vm375_vm1, %v400_v41, %v410_v27 }
  0xc9   : > { %v424_v18 = vpop.permute.xlu0 %423  ;;  %v419_v49 = vpop.permute.xlu1 %418 }
  0xca   : > { %v428_v21 = vsel %vm370_vm4, %v424_v18, %v414_v29  ;;  %v429_v50 = vsel %vm371_vm5, %v424_v18, %v415_v31  ;;  %v426_v51 = vsel %vm368_vm6, %v419_v49, %v412_v47  ;;  %v427_v52 = vsel %vm369_vm7, %v419_v49, %v413_v11 }
  0xcb   : > { %v436_v53 = vmul.f32 %v432_v46, %v428_v21  ;;  %v437_v54 = vmul.f32 %v433_v25, %v429_v50  ;;  %v434_v57 = vmul.f32 %v430_v48, %v426_v51  ;;  %v435_v58 = vmul.f32 %v431_v13, %v427_v52 }
  0xcd   : > { %v448_v59 = vsel %vm444_vm8, %v436_v53, 0.0  ;;  %v449_v60 = vsel %vm445_vm9, %v437_v54, 0.0  ;;  %v446_v61 = vsel %vm442_vm10, %v434_v57, 0.0  ;;  %v447_v62 = vsel %vm443_vm11, %v435_v58, 0.0 }
  0xce   : > { %v452_v63 = vadd.f32 %v448_v59, %v440_v55  ;;  %v453_v0 = vadd.f32 %v449_v60, %v441_v56  ;;  %v465_v1 = vadd.f32 %v447_v62, %v446_v61 }
  0xd0   : > { %456 = vst [vmem:[#allocation2 + $0x10] sm:$0x3f] %v452_v63  ;;  %457 = vst [vmem:[#allocation2 + $0x18] sm:$0x3f] %v453_v0  ;;  %466 = vadd.xlane.f32.xlu0 %v465_v1 }
  0xd7   : > { %v463_v2 = vld [vmem:[#allocation2 + $0x10] sm:$0x3f]  ;;  %v464_v3 = vld [vmem:[#allocation2 + $0x18] sm:$0x3f] }
  0xd8   : > { %v469_v4 = vsel %vm468_vm12, %v463_v2, 0.0  ;;  %v470_v5 = vsel %vm468_vm12, %v464_v3, 0.0 }
  0xd9   : > { %v471_v6 = vadd.f32 %v470_v5, %v469_v4 }
  0xdb   : > { %472 = vadd.xlane.f32.xlu1 %v471_v6 }
 0x15d   : > { %v467_v26 = vpop.xlane.xlu0 %466 }
 0x15e   : > { %v481_v30 = vrot.slane %v467_v26, %v480_v17 }
 0x168   : > { %v473_v28 = vpop.xlane.xlu1 %472 }
 0x169   : > { %v486_v32 = vrot.slane %v473_v28, %v485_v23 }
 0x16b   : > { %v488_v33 = vsel %vm487_vm13, %v486_v32, %v481_v30 }
 0x16c   : > { %491 = vst.msk [vmem:[%s271_s8] sm:$0x1] %vm490_vm14, %v488_v33 }
 0x16d   : > { %772 = shalt.err (!%p769_p13)
}
 0x16e   : > { %s773_s22 = scalar_lea.hbm %s1129_s7, 16  ;;  %s777_s23 = scalar_lea.hbm %s1181_s3, 32 }
 0x16f   : > { %p774_p0 = scmp.ne.s32.totalorder %s1129_s7, %s773_s22  ;;  %p778_p9 = scmp.lt.u32.totalorder %s1129_s7, %s1181_s3 }
 0x170   : > { %p779_p11 = scmp.lt.u32.totalorder %s777_s23, %s773_s22  ;;  %p781_p8 = scmp.lt.u32.totalorder %s773_s22, %s1129_s7 }
 0x171   : > { %p775_p2 = pnand %p774_p0, %p1188_p12 }
 0x172   : > { %p780_p4 = por %p779_p11, %p778_p9 }
 0x173   : > { %p776_p3 = pneg %p775_p2 }
 0x174   : > { %p782_p1 = por %p781_p8, %p780_p4 }
 0x176   : > { %p783_p5 = pnand %p782_p1, %p776_p3 }
 0x178   : > { %786 = shalt.err (!%p783_p5)
}
 0x179   : > { %637 = dma.vmem_to_hbm [thread:$0]  (%p1188_p12), %s1131_s9, 16, %s1129_s7, %s493_s15  }
 0x17a PF: > { %s517_s28 = sand.u32 1, %s821_s12   ;;  %p1189_p6 = scmp.ne.s32.totalorder %s1187_s27, 0 }
 0x17b   : > { %p1190_p7 = scmp.ge.s32.totalorder %s841_s17, 2  ;;  %s518_s6 = scalar_lea.sflag [#allocation5], %s517_s28 }
 0x17d   : > { %p640_p10 = pnand %p1190_p7, %p1189_p6 }
 0x17f   : > { %816 = dma.done.wait (!%p640_p10), %s518_s6, 16  }
 0x180   : > { %818 = vsyncadd (!%p640_p10), %s518_s6, 4294967280  ;;  %s19_s17 = sadd.s32 1, %s841_s17   ;;  %s1191_s12 = smov %s825_s13 }
 0x181   : > { %p16_p13 = scmp.ge.s32.totalorder %s19_s17, 4   ;;  %s1192_s13 = smov %s829_s14 }
 0x182   : > { %s1193_s14 = smov %s926_s26  ;;  %s1194_s15 = smov %s837_s16 }
 0x183   : > { %s1195_s16 = smov %s1197_s20  ;;  %18 = sbr.rel (!%p16_p13) target bundleno = 6 (0x6), region = 138 }
 0x18a   :  { %522 = vsyncpa [#allocation4], 1 }
 0x18b   :  { %524 = vsyncpa [#allocation4 + $0x1], 1 }
 0x18c   :  { %525 = vsyncpa [#allocation5], 1 }
 0x18d   :  { %527 = vsyncpa [#allocation5 + $0x1], 1 }

</bundles_post_ra>
